<compile_context>
chip_gen: v7x
topology: tpu7x:2x2x1
jax: 0.10.0
libtpu: 0.0.40
codegen_flags: <defaults>
</compile_context>

<pallas_src>
import functools

import jax
import jax.numpy as jnp
from jax.experimental import pallas as pl
from jax.experimental.pallas import tpu as pltpu


def _gap1d_kernel(x_ref, o_ref, acc_ref, *, seq_len, l_tile, inv_len):
    """Process one (Bt, Ct, Lt) tile of the (B, C, L) input.

    x_ref   : (Bt, Ct, Lt) input tile (any float dtype).
    o_ref   : (Bt, Ct) output tile, resident across the L grid axis.
    acc_ref : (Bt, Ct) f32 scratch holding the running row sums.
    """
    l = pl.program_id(2)
    num_l = pl.num_programs(2)

    @pl.when(l == 0)
    def _init():
        acc_ref[...] = jnp.zeros_like(acc_ref)

    def _partial_sum(masked):
        x = x_ref[...].astype(jnp.float32)
        if masked:
            lane = jax.lax.broadcasted_iota(jnp.int32, x.shape, dimension=2)
            x = jnp.where(lane + l * l_tile < seq_len, x, 0.0)
        return jnp.sum(x, axis=-1)

    if seq_len % l_tile != 0:
        # Ragged last tile: only the FINAL L step needs masking; the
        # steady-state loop stays a pure load + reduce + add.
        @pl.when(l == num_l - 1)
        def _acc_last():
            acc_ref[...] += _partial_sum(masked=True)

        @pl.when(l < num_l - 1)
        def _acc_body():
            acc_ref[...] += _partial_sum(masked=False)
    else:
        acc_ref[...] += _partial_sum(masked=False)

    @pl.when(l == num_l - 1)
    def _finalize():
        o_ref[...] = (acc_ref[...] * inv_len).astype(o_ref.dtype)


_TARGET_STEP_BYTES = 8 << 20   # ~8 MiB input tile per grid step (x2 buffered)
_MIN_STEP_BYTES = 4 << 20      # for short-L inputs, grow Bt/Ct up to this


def _choose_tiles(B, C, L, itemsize):
    """Pick (Bt, Ct, Lt) honoring (8,128)-or-full constraints on the last two
    dims of both the input (Ct, Lt) and output (Bt, Ct) blocks."""
    # --- L tile: innermost, contiguous DMA rows (kept long: >= 1 KiB) ---
    lt_cap = max(128, (_TARGET_STEP_BYTES // (8 * 128 * itemsize)) // 128 * 128)
    Lt = L if L <= lt_cap else lt_cap

    # --- B / C tiles: hardware-minimum sizes first ---
    Bt = B if B < 8 else 8
    Ct = C if C < 128 else 128

    # Short L: grow Bt/Ct so each grid step still moves enough HBM bytes
    # (per-step pipeline overhead is ~0.35 us).
    if Lt == L:
        step = Bt * Ct * Lt * itemsize
        while step < _MIN_STEP_BYTES and (Bt < B or Ct < C):
            if Ct < C:
                Ct = C if Ct + 128 >= C else Ct + 128
            elif Bt < B:
                Bt = B if Bt + 8 >= B else Bt + 8
            step = Bt * Ct * Lt * itemsize

    # Guarantee >= 2 blocks along a parallel axis when cheaply possible so a
    # 2-TensorCore chip (v7x) can split the work across cores.
    nb, nc = pl.cdiv(B, Bt), pl.cdiv(C, Ct)
    if nb * nc == 1:
        if C >= 256:
            Ct = 128 * pl.cdiv(pl.cdiv(C, 2), 128)
        elif B >= 16:
            Bt = 8 * pl.cdiv(pl.cdiv(B, 2), 8)
        # else: B*C too small to split with valid tiles; single-core reduction.
        # TODO(synk): for tiny B*C with huge L, split L into two partial sums
        # combined in the wrapper to use both TCs.

    return Bt, Ct, Lt


def _gap1d_pallas(x: jax.Array, *, bt=None, ct=None, lt=None) -> jax.Array:
    """Tiled Pallas mean over the last axis: (B, C, L) -> (B, C)."""
    B, C, L = x.shape
    itemsize = x.dtype.itemsize

    aBt, aCt, aLt = _choose_tiles(B, C, L, itemsize)
    Bt = aBt if bt is None else min(bt, B)
    Ct = aCt if ct is None else min(ct, C)
    Lt = aLt if lt is None else min(lt, L)

    grid = (pl.cdiv(B, Bt), pl.cdiv(C, Ct), pl.cdiv(L, Lt))

    # VMEM budget: double-buffered input tiles + small output + accumulator.
    in_tile = Bt * Ct * Lt * itemsize
    out_tile = Bt * Ct * itemsize
    acc_bytes = Bt * Ct * 4
    needed = 2 * in_tile + 2 * out_tile + acc_bytes
    # Explicit limit: covers v5e's 16 MiB scoped default, stays well under
    # v7x's 64 MiB physical VMEM.
    vmem_limit = int(min(48 << 20, max(2 * needed, 24 << 20)))

    kernel = functools.partial(
        _gap1d_kernel, seq_len=L, l_tile=Lt, inv_len=1.0 / L)

    return pl.pallas_call(
        kernel,
        out_shape=jax.ShapeDtypeStruct((B, C), x.dtype),
        grid=grid,
        in_specs=[pl.BlockSpec((Bt, Ct, Lt), lambda b, c, l: (b, c, l))],
        # Same (b, c) block for every l -> output stays resident across the
        # reduction axis; written only on the final L step.
        out_specs=pl.BlockSpec((Bt, Ct), lambda b, c, l: (b, c)),
        scratch_shapes=[pltpu.VMEM((Bt, Ct), jnp.float32)],
        compiler_params=pltpu.CompilerParams(
            dimension_semantics=("parallel", "parallel", "arbitrary"),
            vmem_limit_bytes=vmem_limit),
    )(x)


def global_average_pooling_1d(
    x: jax.Array,
    keepdim: bool = False,
    *,
    force_pallas: bool = False,
    bt: int | None = None,
    ct: int | None = None,
    lt: int | None = None,
) -> jax.Array:
    """x: (B, C, L) -> (B, C)  (or (B, C, 1) if keepdim).  == torch.mean(x, -1)."""
    if x.ndim != 3:
        raise ValueError(f"expected (B, C, L) input, got shape {x.shape}")

    # Tiny inputs: a few-step Pallas grid is dominated by launch/step overhead.
    tiny = (x.size * x.dtype.itemsize) < (1 << 20)
    if tiny and not force_pallas:
        out = jnp.mean(x.astype(jnp.float32), axis=-1).astype(x.dtype)
    else:
        out = _gap1d_pallas(x, bt=bt, ct=ct, lt=lt)

    return out[:, :, None] if keepdim else out


if __name__ == "__main__":
    k0, k1, k2 = jax.random.split(jax.random.PRNGKey(0), 3)

    # --- 1) Small shape matching the module spec: (B, C, L) = (2, 4, 16) ---
    B, C, L = 2, 4, 16
    x = jax.random.normal(k0, (B, C, L), dtype=jnp.float32)

    y = global_average_pooling_1d(x, keepdim=False, force_pallas=True)
    jax.block_until_ready(y)
    assert y.shape == (B, C), y.shape

    y_keep = global_average_pooling_1d(x, keepdim=True, force_pallas=True)
    jax.block_until_ready(y_keep)
    assert y_keep.shape == (B, C, 1), y_keep.shape

    ref = jnp.mean(x, axis=-1)
    assert jnp.allclose(y, ref, atol=1e-5, rtol=1e-5)
    assert jnp.allclose(y_keep[..., 0], ref, atol=1e-5, rtol=1e-5)

    # --- 2) Tiled path: partial B/C tiles + ragged-L masked last step (bf16) ---
    B2, C2, L2 = 9, 260, 400
    x2 = jax.random.normal(k1, (B2, C2, L2), dtype=jnp.bfloat16)
    y2 = global_average_pooling_1d(
        x2, keepdim=False, force_pallas=True, bt=8, ct=128, lt=256)
    jax.block_until_ready(y2)
    assert y2.shape == (B2, C2), y2.shape
    ref2 = jnp.mean(x2.astype(jnp.float32), axis=-1)
    assert jnp.allclose(y2.astype(jnp.float32), ref2, atol=1e-2, rtol=1e-2)

    # --- 3) Auto-tiling path: short-L tile growth + 2-TC C split ---
    B3, C3, L3 = 4, 256, 1024
    x3 = jax.random.normal(k2, (B3, C3, L3), dtype=jnp.float32)
    y3 = global_average_pooling_1d(x3, keepdim=False, force_pallas=True)
    jax.block_until_ready(y3)
    ref3 = jnp.mean(x3, axis=-1)
    assert jnp.allclose(y3, ref3, atol=1e-4, rtol=1e-4)

    print("KERNEL_OK")
</pallas_src>

<mosaic_0001>
module attributes {stable_mosaic.version = 11 : i64} {
  func.func @_gap1d_kernel(%arg0: i32, %arg1: i32, %arg2: i32, %arg3: memref<2x4x16xf32, #tpu.memory_space<vmem>>, %arg4: memref<2x4xf32, #tpu.memory_space<vmem>>, %arg5: memref<2x4xf32, #tpu.memory_space<vmem>>) attributes {dimension_semantics = [#tpu.dimension_semantics<parallel>, #tpu.dimension_semantics<parallel>, #tpu.dimension_semantics<arbitrary>], iteration_bounds = array<i64: 1, 1, 1>, scalar_prefetch = 0 : i64, scratch_operands = 1 : i64, tpu.core_type = #tpu.core_type<tc>, window_params = [{transform_indices = @transform_0, window_bounds = array<i64: 2, 4, 16>}, {transform_indices = @transform_1, window_bounds = array<i64: 2, 4>}]} {
    %c0_i32 = arith.constant 0 : i32
    %0 = arith.cmpi eq, %arg2, %c0_i32 : i32
    %1 = arith.extui %0 : i1 to i32
    %c0_i32_0 = arith.constant 0 : i32
    %2 = arith.cmpi ne, %1, %c0_i32_0 : i32
    scf.if %2 {
      %cst_9 = arith.constant 0.000000e+00 : f32
      %11 = vector.broadcast %cst_9 : f32 to vector<2x4xf32>
      %c0_10 = arith.constant 0 : index
      %c0_11 = arith.constant 0 : index
      %12 = vector.load %arg5[%c0_10, %c0_11] : memref<2x4xf32, #tpu.memory_space<vmem>>, vector<2x4xf32>
      tpu.vector_store %arg5[%c0_10, %c0_11], %11 {strides = array<i32>} : memref<2x4xf32, #tpu.memory_space<vmem>>, vector<2x4xf32>,
    } else {
    }
    %c0 = arith.constant 0 : index
    %c0_1 = arith.constant 0 : index
    %3 = vector.load %arg5[%c0, %c0_1] : memref<2x4xf32, #tpu.memory_space<vmem>>, vector<2x4xf32>
    %c0_2 = arith.constant 0 : index
    %c0_3 = arith.constant 0 : index
    %c0_4 = arith.constant 0 : index
    %4 = vector.load %arg3[%c0_2, %c0_3, %c0_4] : memref<2x4x16xf32, #tpu.memory_space<vmem>>, vector<2x4x16xf32>
    %cst = arith.constant dense<0.000000e+00> : vector<2x4xf32>
    %5 = vector.multi_reduction <add>, %4, %cst [2] : vector<2x4x16xf32> to vector<2x4xf32>
    %6 = arith.addf %3, %5 : vector<2x4xf32>
    %c0_5 = arith.constant 0 : index
    %c0_6 = arith.constant 0 : index
    %7 = vector.load %arg5[%c0_5, %c0_6] : memref<2x4xf32, #tpu.memory_space<vmem>>, vector<2x4xf32>
    tpu.vector_store %arg5[%c0_5, %c0_6], %6 {strides = array<i32>} : memref<2x4xf32, #tpu.memory_space<vmem>>, vector<2x4xf32>,
    %c0_i32_7 = arith.constant 0 : i32
    %8 = arith.cmpi eq, %arg2, %c0_i32_7 : i32
    %9 = arith.extui %8 : i1 to i32
    %c0_i32_8 = arith.constant 0 : i32
    %10 = arith.cmpi ne, %9, %c0_i32_8 : i32
    scf.if %10 {
      %c0_9 = arith.constant 0 : index
      %c0_10 = arith.constant 0 : index
      %11 = vector.load %arg5[%c0_9, %c0_10] : memref<2x4xf32, #tpu.memory_space<vmem>>, vector<2x4xf32>
      %cst_11 = arith.constant 6.250000e-02 : f32
      %12 = vector.broadcast %cst_11 : f32 to vector<2x4xf32>
      %13 = arith.mulf %11, %12 : vector<2x4xf32>
      %c0_12 = arith.constant 0 : index
      %c0_13 = arith.constant 0 : index
      %14 = vector.load %arg4[%c0_12, %c0_13] : memref<2x4xf32, #tpu.memory_space<vmem>>, vector<2x4xf32>
      tpu.vector_store %arg4[%c0_12, %c0_13], %13 {strides = array<i32>} : memref<2x4xf32, #tpu.memory_space<vmem>>, vector<2x4xf32>,
    } else {
    }
    return
  }
  func.func @transform_0(%arg0: i32, %arg1: i32, %arg2: i32) -> (i32, i32, i32) {
    %c0_i32 = arith.constant 0 : i32
    return %arg0, %arg1, %arg2 : i32, i32, i32
  }
  func.func @transform_1(%arg0: i32, %arg1: i32, %arg2: i32) -> (i32, i32) {
    %c0_i32 = arith.constant 0 : i32
    return %arg0, %arg1 : i32, i32
  }
}

</mosaic_0001>

<bundles_post_ra>
// kernel: tpu_custom_call.1
= control target key start
LH: loop header
LB: loop body
LE: loop exit
PB: predicated region body
PF: predicated region fallthrough
CT: control target
= control target key end

     0   :  { %6 = vsyncpa [#allocation4], 0  ;;  %s173_s0 = inlined_call_operand.hbm [shape: f32[2,4,16], index: 0, kind: input, shape index: {}]   ;;  %s174_s1 = inlined_call_operand.hbm [shape: f32[2,4], index: 1, kind: output, shape index: {}]  }
   0x1   :  { %7 = vsyncpa [#allocation5], 0  ;;  %s131_s6 = smov [#allocation3]   ;;  %s83_s10 = scalar_lea.hbm %s173_s0, 128 }
   0x2   :  { %s13_s7 = sshll.u32 %s131_s6, 4  ;;  %p84_p0 = scmp.ne.s32.totalorder %s173_s0, %s83_s10  ;;  %s14_s7 = int_to_ptr.vmem [resolvable:$true] %s13_s7 }
   0x3   :  { %p87_p1 = scmp.lt.u32.totalorder %s83_s10, %s173_s0 }
   0x5   :  { %p89_p2 = pnand %p87_p1, %p84_p0 }
   0x7   :  { %92 = shalt.err (!%p89_p2)
}
   0x8   :  { %s93_s15 = scalar_lea.vmem %s14_s7, 128  ;;  %p98_p4 = scmp.lt.s32.totalorder %s14_s7, %s14_s7 }
   0x9   :  { %p94_p3 = scmp.ne.s32.totalorder %s14_s7, %s93_s15  ;;  %p99_p5 = scmp.lt.s32.totalorder %s93_s15, %s93_s15 }
   0xb   :  { %p100_p6 = por %p99_p5, %p98_p4 }
   0xd   :  { %p101_p7 = pnand %p100_p6, %p94_p3 }
   0xf   :  { %104 = shalt.err (!%p101_p7)
}
  0x10   :  { %s132_s16 = smov 64   ;;  %s133_s17 = smov 4  }
  0x11   :  { %19 = dma.hbm_to_vmem [thread:$0]  %s173_s0, 128, %s14_s7, [#allocation4], %s132_s16, %s132_s16, %s133_s17  }
  0x12   :  { %127 = dma.done.wait [#allocation4], 128  }
  0x13   :  { %128 = vsyncadd [#allocation4], 4294967168  ;;  %vm32_vm0 = vcmask 125952   ;;  %v30_v0 = vld [vmem:[#allocation3] sm:$0xf]  ;;  %vm27_vm1 = vcmask 25600   ;;  %v41_v5 = vlaneseq }
  0x14   :  { %v31_v1 = vld [vmem:[#allocation3 + $0x4] sm:$0xf]  ;;  %v33_v2 = vsel %vm32_vm0, %v30_v0, 0.0  ;;  %v134_v4 = vmov 0.0   ;;  %vm51_vm2 = vcmask 1041409   ;;  %s135_s0 = smov [#allocation6]  }
  0x15   :  { %34 = vadd.xlane.f32.xlu0 %v33_v2  ;;  %v36_v3 = vsel %vm32_vm0, %v31_v1, 0.0  ;;  %28 = vst.msk [vmem:[#allocation2] sm:$0x3] %vm27_vm1, %v134_v4  ;;  %v42_v6 = vand.u32 127, %v41_v5  ;;  %v44_v7 = vshrl.u32 %v41_v5, 7  ;;  %s69_s20 = sshll.u32 %s135_s0, 4  ;;  %s70_s20 = int_to_ptr.vmem [resolvable:$true] %s69_s20 }
  0x16   :  { %s105_s21 = scalar_lea.vmem %s70_s20, 32  ;;  %p110_p9 = scmp.lt.s32.totalorder %s70_s20, %s70_s20 }
  0x17   :  { %v45_v9 = vsub.s32 %v42_v6, %v44_v7  ;;  %p106_p8 = scmp.ne.s32.totalorder %s70_s20, %s105_s21  ;;  %p111_p10 = scmp.lt.s32.totalorder %s105_s21, %s105_s21 }
  0x19   :  { %37 = vadd.xlane.f32.xlu0 %v36_v3  ;;  %p112_p11 = por %p111_p10, %p110_p9 }
  0x1b   :  { %p113_p12 = pnand %p112_p11, %p106_p8 }
  0x1c   :  { %v29_v13 = vld [vmem:[#allocation2] sm:$0x3] }
  0xa2   :  { %v35_v8 = vpop.xlane.xlu0 %34 }
  0xa3   :  { %v46_v11 = vrot.slane %v35_v8, %v45_v9 }
  0xa6   :  { %v38_v10 = vpop.xlane.xlu0 %37 }
  0xa7   :  { %v50_v12 = vrot.slane %v38_v10, %v45_v9 }
  0xa9   :  { %v52_v14 = vsel %vm51_vm2, %v50_v12, %v46_v11 }
  0xaa   :  { %v54_v15 = vadd.f32 %v52_v14, %v29_v13 }
  0xac   :  { %56 = vst.msk [vmem:[#allocation2] sm:$0x3] %vm27_vm1, %v54_v15 }
  0xb3   :  { %v60_v16 = vld [vmem:[#allocation2] sm:$0x3] }
  0xb4   :  { %v61_v17 = vmul.f32 0.0625, %v60_v16 }
  0xb6   :  { %62 = vst.msk [vmem:[#allocation6] sm:$0x3] %vm27_vm1, %v61_v17 }
  0xb7   :  { %116 = shalt.err (!%p113_p12)
}
  0xb8   :  { %s117_s24 = scalar_lea.hbm %s174_s1, 32 }
  0xb9   :  { %p118_p13 = scmp.ne.s32.totalorder %s174_s1, %s117_s24  ;;  %p121_p0 = scmp.lt.u32.totalorder %s117_s24, %s174_s1 }
  0xbb   :  { %p123_p1 = pnand %p121_p0, %p118_p13 }
  0xbd   :  { %126 = shalt.err (!%p123_p1)
}
  0xbe   :  { %72 = dma.vmem_to_hbm [thread:$0]  %s70_s20, 32, %s174_s1, [#allocation5]  }
  0xbf   :  { %129 = dma.done.wait [#allocation5], 32  }
  0xc0   :  { %130 = vsyncadd [#allocation5], 4294967264 }
  0xc1   :  { %76 = vsyncpa [#allocation4], 1 }
  0xc2   :  { %77 = vsyncpa [#allocation5], 1 }

</bundles_post_ra>
